<compile_context>
chip_gen: v7x
topology: tpu7x:2x2x1
jax: 0.10.0
libtpu: 0.0.40
codegen_flags: <defaults>
</compile_context>

<pallas_src>
import functools

import jax
import jax.numpy as jnp
from jax import lax
from jax.experimental import pallas as pl
from jax.experimental.pallas import tpu as pltpu


def _matmul_shift_relu_kernel(p_ref, w_ref, shift_ref, o_ref):
    """One M-tile of: relu(patches @ w_scaled + shift). BN scale is pre-folded."""
    acc = jnp.dot(p_ref[...], w_ref[...], preferred_element_type=jnp.float32)
    o_ref[...] = jnp.maximum(acc + shift_ref[...], 0.0).astype(o_ref.dtype)


def _im2col(x_nhwc, kh, kw, stride, padding):
    """Extract convolution patches. Returns [N, OH, OW, KH*KW*C_in], OH, OW."""
    n, h, w, c = x_nhwc.shape
    xp = jnp.pad(x_nhwc, ((0, 0), (padding, padding), (padding, padding), (0, 0)))
    hp, wp = h + 2 * padding, w + 2 * padding
    oh = (hp - kh) // stride + 1
    ow = (wp - kw) // stride + 1
    slices = []
    for i in range(kh):
        for j in range(kw):
            sl = lax.slice(
                xp,
                (0, i, j, 0),
                (n, i + (oh - 1) * stride + 1, j + (ow - 1) * stride + 1, c),
                (1, stride, stride, 1),
            )  # [N, OH, OW, C]
            slices.append(sl)
    patches = jnp.stack(slices, axis=3)            # [N, OH, OW, KH*KW, C]
    return patches.reshape(n, oh, ow, kh * kw * c), oh, ow


def _round_up(x, m):
    return ((x + m - 1) // m) * m


def _choose_tile_m(m_dim, k_pad, n_pad, vmem_budget_bytes=20 * 1024 * 1024):
    """Largest M tile whose double-buffered working set fits the VMEM budget
    while keeping >= 2 grid steps (so both v7x TensorCores get work)."""
    for tm in (1024, 512, 256):
        buf_bytes = (2 * tm * k_pad * 2        # 2x double-buffered bf16 patch tiles
                     + k_pad * n_pad * 2       # resident bf16 weight block
                     + 2 * n_pad * 4           # shift row
                     + 2 * tm * n_pad * 4)     # 2x double-buffered f32 output tiles
        if buf_bytes <= vmem_budget_bytes and m_dim >= 2 * tm:
            return tm
    return 128


@functools.partial(jax.jit, static_argnames=("stride", "padding", "eps"))
def basic_conv2d(x_nchw, weight_oihw, gamma, beta, running_mean, running_var,
                 *, stride, padding, eps=1e-3):
    """Forward pass of BasicConv2d. x: [N, C_in, H, W] -> [N, C_out, OH, OW]."""
    n, c_in, h, w = x_nchw.shape
    c_out, c_in_w, kh, kw = weight_oihw.shape
    assert c_in == c_in_w

    # --- glue (plain JAX): layout conversion, im2col, BN folding, padding ----
    x_nhwc = jnp.transpose(x_nchw, (0, 2, 3, 1)).astype(jnp.bfloat16)
    patches, oh, ow = _im2col(x_nhwc, kh, kw, stride, padding)

    k_dim = kh * kw * c_in
    m_dim = n * oh * ow
    k_pad = _round_up(k_dim, 128)           # lane-dense MXU contraction dim
    n_pad = _round_up(c_out, 128)           # lane-dense output / MXU N dim
    tm = _choose_tile_m(m_dim, k_pad, n_pad)
    m_pad = _round_up(m_dim, tm)

    patches = patches.reshape(m_dim, k_dim)
    if (m_pad, k_pad) != (m_dim, k_dim):
        # Single pad of the patch matrix (M and K together); fuses with im2col.
        patches = jnp.pad(patches, ((0, m_pad - m_dim), (0, k_pad - k_dim)))

    # Fold eval-mode BN into the weights (per-channel scale commutes with conv).
    scale = gamma.astype(jnp.float32) / jnp.sqrt(
        running_var.astype(jnp.float32) + eps)
    shift = beta.astype(jnp.float32) - running_mean.astype(jnp.float32) * scale

    # weight [C_out, C_in, KH, KW] -> [KH, KW, C_in, C_out] -> [K, C_out]
    w_mat = jnp.transpose(weight_oihw, (2, 3, 1, 0)).reshape(k_dim, c_out)
    w_mat = (w_mat.astype(jnp.float32) * scale[None, :]).astype(jnp.bfloat16)
    w_mat = jnp.pad(w_mat, ((0, k_pad - k_dim), (0, n_pad - c_out)))
    shift_row = jnp.pad(shift, (0, n_pad - c_out)).reshape(1, n_pad)

    # --- hot path: fused matmul + BN-shift + ReLU in Pallas ------------------
    flops = 2 * m_pad * k_pad * n_pad
    bytes_accessed = (m_pad * k_pad * 2       # bf16 patches
                      + k_pad * n_pad * 2     # bf16 weight
                      + n_pad * 4             # f32 shift
                      + m_pad * n_pad * 4)    # f32 output

    out_flat = pl.pallas_call(
        _matmul_shift_relu_kernel,
        out_shape=jax.ShapeDtypeStruct((m_pad, n_pad), jnp.float32),
        grid_spec=pltpu.PrefetchScalarGridSpec(
            num_scalar_prefetch=0,
            grid=(m_pad // tm,),
            in_specs=[
                pl.BlockSpec((tm, k_pad), lambda i: (i, 0)),
                pl.BlockSpec((k_pad, n_pad), lambda i: (0, 0)),   # resident weight
                pl.BlockSpec((1, n_pad), lambda i: (0, 0)),       # resident shift
            ],
            out_specs=pl.BlockSpec((tm, n_pad), lambda i: (i, 0)),
        ),
        compiler_params=pltpu.CompilerParams(
            dimension_semantics=("parallel",),
            vmem_limit_bytes=32 * 1024 * 1024,
        ),
        cost_estimate=pl.CostEstimate(
            flops=flops, transcendentals=0, bytes_accessed=bytes_accessed),
    )(patches, w_mat, shift_row)

    out = out_flat[:m_dim, :c_out].reshape(n, oh, ow, c_out)
    return jnp.transpose(out, (0, 3, 1, 2)).astype(jnp.float32)  # back to NCHW


def _reference(x_nchw, weight_oihw, gamma, beta, mean, var, *, stride, padding,
               eps=1e-3):
    """Plain-JAX f32 reference (lax.conv + eval BN + relu) for validation."""
    y = lax.conv_general_dilated(
        x_nchw.astype(jnp.float32), weight_oihw.astype(jnp.float32),
        window_strides=(stride, stride),
        padding=[(padding, padding), (padding, padding)],
        dimension_numbers=("NCHW", "OIHW", "NCHW"),
        precision=lax.Precision.HIGHEST,
    )
    scale = gamma / jnp.sqrt(var + eps)
    shift = beta - mean * scale
    y = y * scale[None, :, None, None] + shift[None, :, None, None]
    return jnp.maximum(y, 0.0)


if __name__ == "__main__":
    # BasicConv2d(in_planes=4, out_planes=8, kernel_size=3, stride=1, padding=1)
    N, C_IN, H, W = 2, 4, 16, 16
    C_OUT, KSIZE, STRIDE, PAD = 8, 3, 1, 1

    key = jax.random.PRNGKey(0)
    kx, kw_, kg, kb, km, kv = jax.random.split(key, 6)

    x = jax.random.normal(kx, (N, C_IN, H, W), dtype=jnp.float32)
    weight = jax.random.normal(kw_, (C_OUT, C_IN, KSIZE, KSIZE),
                               dtype=jnp.float32) * 0.1
    gamma = jax.random.normal(kg, (C_OUT,), dtype=jnp.float32) * 0.1 + 1.0
    beta = jax.random.normal(kb, (C_OUT,), dtype=jnp.float32) * 0.1
    running_mean = jax.random.normal(km, (C_OUT,), dtype=jnp.float32) * 0.1
    running_var = jax.random.uniform(kv, (C_OUT,), dtype=jnp.float32,
                                     minval=0.5, maxval=1.5)

    out = basic_conv2d(x, weight, gamma, beta, running_mean, running_var,
                       stride=STRIDE, padding=PAD)
    out = jax.block_until_ready(out)

    ref = _reference(x, weight, gamma, beta, running_mean, running_var,
                     stride=STRIDE, padding=PAD)
    assert out.shape == (N, C_OUT, H, W), out.shape
    # bf16 operands (f32 accumulation) vs. f32 reference -> loosened tolerance.
    assert jnp.allclose(out, ref, atol=5e-2, rtol=5e-2), (
        float(jnp.max(jnp.abs(out - ref))))

    print("KERNEL_OK")
</pallas_src>

<mosaic_0001>
module attributes {stable_mosaic.version = 11 : i64} {
  func.func @_matmul_shift_relu_kernel(%arg0: i32, %arg1: memref<256x128xbf16, #tpu.memory_space<vmem>>, %arg2: memref<128x128xbf16, #tpu.memory_space<vmem>>, %arg3: memref<1x128xf32, #tpu.memory_space<vmem>>, %arg4: memref<256x128xf32, #tpu.memory_space<vmem>>) attributes {dimension_semantics = [#tpu.dimension_semantics<parallel>], iteration_bounds = array<i64: 2>, scalar_prefetch = 0 : i64, scratch_operands = 0 : i64, tpu.core_type = #tpu.core_type<tc>, window_params = [{transform_indices = @transform_0, window_bounds = array<i64: 256, 128>}, {pipeline_mode = #tpu.pipeline_mode<synchronous>, transform_indices = @transform_1, window_bounds = array<i64: 128, 128>}, {pipeline_mode = #tpu.pipeline_mode<synchronous>, transform_indices = @transform_2, window_bounds = array<i64: 1, 128>}, {transform_indices = @transform_3, window_bounds = array<i64: 256, 128>}]} {
    %c0 = arith.constant 0 : index
    %c0_0 = arith.constant 0 : index
    %0 = vector.load %arg1[%c0, %c0_0] : memref<256x128xbf16, #tpu.memory_space<vmem>>, vector<256x128xbf16>
    %c0_1 = arith.constant 0 : index
    %c0_2 = arith.constant 0 : index
    %1 = vector.load %arg2[%c0_1, %c0_2] : memref<128x128xbf16, #tpu.memory_space<vmem>>, vector<128x128xbf16>
    %cst = arith.constant dense<0.000000e+00> : vector<256x128xf32>
    %2 = tpu.matmul %0, %1, %cst {dimension_numbers = #tpu.dot_dimension_numbers<[1], [0], [0], [1], [0, 0, 1, 1], [], []>} : vector<256x128xbf16>, vector<128x128xbf16>, vector<256x128xf32> -> vector<256x128xf32>
    %c0_3 = arith.constant 0 : index
    %c0_4 = arith.constant 0 : index
    %3 = vector.load %arg3[%c0_3, %c0_4] : memref<1x128xf32, #tpu.memory_space<vmem>>, vector<1x128xf32>
    %4 = vector.broadcast %3 : vector<1x128xf32> to vector<256x128xf32>
    %5 = arith.addf %2, %4 : vector<256x128xf32>
    %cst_5 = arith.constant 0.000000e+00 : f32
    %6 = vector.broadcast %cst_5 : f32 to vector<256x128xf32>
    %7 = arith.maximumf %5, %6 : vector<256x128xf32>
    %c0_6 = arith.constant 0 : index
    %c0_7 = arith.constant 0 : index
    %8 = vector.load %arg4[%c0_6, %c0_7] : memref<256x128xf32, #tpu.memory_space<vmem>>, vector<256x128xf32>
    tpu.vector_store %arg4[%c0_6, %c0_7], %7 {strides = array<i32>} : memref<256x128xf32, #tpu.memory_space<vmem>>, vector<256x128xf32>,
    return
  }
  func.func @transform_0(%arg0: i32) -> (i32, i32) {
    %c0_i32 = arith.constant 0 : i32
    %c0_i32_0 = arith.constant 0 : i32
    return %arg0, %c0_i32 : i32, i32
  }
  func.func @transform_1(%arg0: i32) -> (i32, i32) {
    %c0_i32 = arith.constant 0 : i32
    %c0_i32_0 = arith.constant 0 : i32
    %c0_i32_1 = arith.constant 0 : i32
    return %c0_i32, %c0_i32_0 : i32, i32
  }
  func.func @transform_2(%arg0: i32) -> (i32, i32) {
    %c0_i32 = arith.constant 0 : i32
    %c0_i32_0 = arith.constant 0 : i32
    %c0_i32_1 = arith.constant 0 : i32
    return %c0_i32, %c0_i32_0 : i32, i32
  }
  func.func @transform_3(%arg0: i32) -> (i32, i32) {
    %c0_i32 = arith.constant 0 : i32
    %c0_i32_0 = arith.constant 0 : i32
    return %arg0, %c0_i32 : i32, i32
  }
}

</mosaic_0001>

<bundles_post_ra>
// kernel: basic_conv2d.1
= control target key start
LH: loop header
LB: loop body
LE: loop exit
PB: predicated region body
PF: predicated region fallthrough
CT: control target
= control target key end

     0   :  { %s839_s12 = smov 0   ;;  %s973_s0 = inlined_call_operand.vmem [shape: bf16[512,128], index: 0, kind: input, shape index: {}]   ;;  %s974_s1 = inlined_call_operand.vmem [shape: bf16[128,128], index: 1, kind: input, shape index: {}]   ;;  %s975_s2 = inlined_call_operand.vmem [shape: f32[1,128], index: 2, kind: input, shape index: {}]   ;;  %s976_s3 = inlined_call_operand.vmem [shape: f32[512,128], index: 3, kind: output, shape index: {}]  }
   0x1 LB: > { %s655_s13 = sadd.s32 4294967295, %s817_s12   ;;  %p659_p0 = scmp.ge.s32.totalorder %s817_s12, 1  ;;  %s817_s12 = sphi %s839_s12, %s13_s12  }
   0x2   : > { %p138_p1 = scmp.lt.s32.totalorder %s817_s12, 3 }
   0x4   : > { %p139_p2 = pnand %p659_p0, %p138_p1 }
   0x5   : > { %v787_v0 = vld [vmem:[%s974_s1] sm:$0xff] (!%p139_p2)   ;;  %s660_s16 = sshll.u32 (!%p139_p2), %s655_s13, 5  ;;  %v788_v1 = vld [vmem:[%s974_s1 + $0x8] sm:$0xff] (!%p139_p2)   ;;  %v789_v2 = vld [vmem:[%s974_s1 + $0x10] sm:$0xff] (!%p139_p2)  }
   0x6   : > { %142 = sbr.rel (%p139_p2) target bundleno = 282 (0x11a), region = 32  ;;  %p163_p3 = scmp.lt.s32.totalorder (!%p139_p2), %s660_s16, 63  ;;  %715 = vmatprep.subr.bf16.mxu0 (!%p139_p2), %v787_v0  ;;  %763 = vmatprep.subr.bf16.mxu1 (!%p139_p2), %v787_v0  ;;  %v790_v3 = vld [vmem:[%s974_s1 + $0x18] sm:$0xff] (!%p139_p2)   ;;  %v791_v6 = vld [vmem:[%s974_s1 + $0x20] sm:$0xff] (!%p139_p2)   ;;  %v792_v7 = vld [vmem:[%s974_s1 + $0x28] sm:$0xff] (!%p139_p2)  }
   0x7   : > { %716 = vmatpush3.bf16.msra.mxu0 (!%p139_p2), %v787_v0  ;;  %771 = vmatpush3.bf16.msra.mxu1 (!%p139_p2), %v787_v0  ;;  %v793_v8 = vld [vmem:[%s974_s1 + $0x30] sm:$0xff] (!%p139_p2)   ;;  %v794_v9 = vld [vmem:[%s974_s1 + $0x38] sm:$0xff] (!%p139_p2)   ;;  %v898_v24 = vld [vmem:[%s975_s2] ss:$0 sm:$0xff] (!%p139_p2) }
   0x8   : > { %717 = vmatprep.subr.bf16.mxu0 (!%p139_p2), %v788_v1  ;;  %764 = vmatprep.subr.bf16.mxu1 (!%p139_p2), %v788_v1 }
   0xb   : > { %718 = vmatpush3.bf16.msra.mxu0 (!%p139_p2), %v788_v1  ;;  %772 = vmatpush3.bf16.msra.mxu1 (!%p139_p2), %v788_v1 }
   0xc   : > { %719 = vmatprep.subr.bf16.mxu0 (!%p139_p2), %v789_v2  ;;  %765 = vmatprep.subr.bf16.mxu1 (!%p139_p2), %v789_v2 }
   0xd   : > { %s978_s16 = smov (!%p163_p3, %s660_s16), 63 }
   0xe   : > { %s661_s21 = sshll.u32 %s978_s16, 2  ;;  %s663_s10 = sshll.u32 %s978_s16, 3 }
   0xf   : > { %s862_s24 = scalar_lea.vmem %s973_s0, %s661_s21  ;;  %720 = vmatpush3.bf16.msra.mxu0 %v789_v2  ;;  %773 = vmatpush3.bf16.msra.mxu1 %v789_v2  ;;  %s906_s14 = scalar_lea.vmem %s976_s3, %s663_s10 }
  0x10   : > { %v795_v4 = vld [vmem:[%s862_s24] sm:$0xff]   ;;  %721 = vmatprep.subr.bf16.mxu0 %v790_v3  ;;  %766 = vmatprep.subr.bf16.mxu1 %v790_v3  ;;  %v797_v10 = vld [vmem:[%s862_s24 + $0x8] sm:$0xff]   ;;  %v799_v12 = vld [vmem:[%s862_s24 + $0x10] sm:$0xff]  }
  0x11   : > { %v796_v5 = vld [vmem:[%s862_s24 + $0x40] sm:$0xff]   ;;  %731 = vmatprep.mubr.bf16.mxu0 %v795_v4  ;;  %v798_v11 = vld [vmem:[%s862_s24 + $0x48] sm:$0xff]   ;;  %v800_v13 = vld [vmem:[%s862_s24 + $0x50] sm:$0xff]  }
  0x12   : > { %747 = vmatprep.mubr.bf16.mxu1 %v796_v5  ;;  %v801_v14 = vld [vmem:[%s862_s24 + $0x18] sm:$0xff]   ;;  %v803_v16 = vld [vmem:[%s862_s24 + $0x20] sm:$0xff]   ;;  %v805_v18 = vld [vmem:[%s862_s24 + $0x28] sm:$0xff]  }
  0x13   : > { %722 = vmatpush3.bf16.msra.mxu0 %v790_v3  ;;  %774 = vmatpush3.bf16.msra.mxu1 %v790_v3  ;;  %v802_v15 = vld [vmem:[%s862_s24 + $0x58] sm:$0xff]   ;;  %v804_v17 = vld [vmem:[%s862_s24 + $0x60] sm:$0xff]   ;;  %v806_v19 = vld [vmem:[%s862_s24 + $0x68] sm:$0xff]  }
  0x14   : > { %723 = vmatprep.subr.bf16.mxu0 %v791_v6  ;;  %767 = vmatprep.subr.bf16.mxu1 %v791_v6  ;;  %v807_v20 = vld [vmem:[%s862_s24 + $0x30] sm:$0xff]   ;;  %v809_v22 = vld [vmem:[%s862_s24 + $0x38] sm:$0xff]  }
  0x15   : > { %v808_v21 = vld [vmem:[%s862_s24 + $0x70] sm:$0xff]   ;;  %v810_v23 = vld [vmem:[%s862_s24 + $0x78] sm:$0xff]  }
  0x17   : > { %724 = vmatpush3.bf16.msra.mxu0 %v791_v6  ;;  %775 = vmatpush3.bf16.msra.mxu1 %v791_v6 }
  0x18   : > { %725 = vmatprep.subr.bf16.mxu0 %v792_v7  ;;  %768 = vmatprep.subr.bf16.mxu1 %v792_v7 }
  0x1b   : > { %726 = vmatpush3.bf16.msra.mxu0 %v792_v7  ;;  %776 = vmatpush3.bf16.msra.mxu1 %v792_v7 }
  0x1c   : > { %727 = vmatprep.subr.bf16.mxu0 %v793_v8  ;;  %769 = vmatprep.subr.bf16.mxu1 %v793_v8 }
  0x1f   : > { %728 = vmatpush3.bf16.msra.mxu0 %v793_v8  ;;  %777 = vmatpush3.bf16.msra.mxu1 %v793_v8 }
  0x20   : > { %729 = vmatprep.subr.bf16.mxu0 %v794_v9  ;;  %770 = vmatprep.subr.bf16.mxu1 %v794_v9 }
  0x23   : > { %730 = vmatpush3.bf16.msra.mxu0 %v794_v9  ;;  %778 = vmatpush3.bf16.msra.mxu1 %v794_v9 }
  0x26   : > { %732 = vmatmul.mubr.bf16.vlgmr.msra.gmra.mrb[0].mxu0 %v797_v10  ;;  %748 = vmatmul.mubr.bf16.vlgmr.msra.gmra.mrb[0].mxu1 %v798_v11 }
  0x27   : > { %735 = vmatprep.mubr.bf16.mxu0 %v799_v12  ;;  %751 = vmatprep.mubr.bf16.mxu1 %v800_v13 }
  0x2e   : > { %736 = vmatmul.mubr.bf16.gmra.mrb[4].mxu0 %v801_v14  ;;  %752 = vmatmul.mubr.bf16.gmra.mrb[4].mxu1 %v802_v15 }
  0x2f   : > { %739 = vmatprep.mubr.bf16.mxu0 %v803_v16  ;;  %755 = vmatprep.mubr.bf16.mxu1 %v804_v17 }
  0x36   : > { %740 = vmatmul.mubr.bf16.gmra.mrb[8].mxu0 %v805_v18  ;;  %756 = vmatmul.mubr.bf16.gmra.mrb[8].mxu1 %v806_v19 }
  0x37   : > { %743 = vmatprep.mubr.bf16.mxu0 %v807_v20  ;;  %759 = vmatprep.mubr.bf16.mxu1 %v808_v21 }
  0x3e   : > { %744 = vmatmul.mubr.bf16.gmra.mrb[12].mxu0 %v809_v22  ;;  %760 = vmatmul.mubr.bf16.gmra.mrb[12].mxu1 %v810_v23 }
  0xf9   : > { %v733_v25 = vpop.f32.mrb[0].mxu0  ;;  %v749_v26 = vpop.f32.mrb[0].mxu1 }
  0xfa   : > { %v417_v27 = vadd.f32 %v733_v25, %v898_v24  ;;  %v481_v28 = vadd.f32 %v749_v26, %v898_v24  ;;  %v408_v29 = vpop.f32.mrb[1].mxu0  ;;  %v472_v30 = vpop.f32.mrb[1].mxu1 }
  0xfb   : > { %v409_v31 = vadd.f32 %v898_v24, %v408_v29  ;;  %v473_v32 = vadd.f32 %v898_v24, %v472_v30  ;;  %v734_v33 = vpop.f32.mrb[2].mxu0  ;;  %v750_v34 = vpop.f32.mrb[2].mxu1 }
  0xfc   : > { %v537_v35 = vmax.f32 %v417_v27, 0.0  ;;  %v553_v36 = vmax.f32 %v481_v28, 0.0  ;;  %v420_v37 = vadd.f32 %v734_v33, %v898_v24  ;;  %v484_v38 = vadd.f32 %v750_v34, %v898_v24  ;;  %v411_v39 = vpop.f32.mrb[3].mxu0  ;;  %v475_v40 = vpop.f32.mrb[3].mxu1 }
  0xfd   : > { %v535_v41 = vmax.f32 %v409_v31, 0.0  ;;  %v551_v42 = vmax.f32 %v473_v32, 0.0  ;;  %v412_v43 = vadd.f32 %v898_v24, %v411_v39  ;;  %v476_v44 = vadd.f32 %v898_v24, %v475_v40 }
  0xfe   : > { %569 = vst [vmem:[%s906_s14 + $0x10] sm:$0xff] %v537_v35  ;;  %585 = vst [vmem:[%s906_s14 + $0x90] sm:$0xff] %v553_v36  ;;  %v538_v45 = vmax.f32 %v420_v37, 0.0  ;;  %v554_v46 = vmax.f32 %v484_v38, 0.0 }
  0xff   : > { %567 = vst [vmem:[%s906_s14] sm:$0xff] %v535_v41  ;;  %583 = vst [vmem:[%s906_s14 + $0x80] sm:$0xff] %v551_v42  ;;  %v536_v47 = vmax.f32 %v412_v43, 0.0  ;;  %v552_v48 = vmax.f32 %v476_v44, 0.0 }
 0x100   : > { %570 = vst [vmem:[%s906_s14 + $0x18] sm:$0xff] %v538_v45  ;;  %586 = vst [vmem:[%s906_s14 + $0x98] sm:$0xff] %v554_v46 }
 0x101   : > { %568 = vst [vmem:[%s906_s14 + $0x8] sm:$0xff] %v536_v47  ;;  %584 = vst [vmem:[%s906_s14 + $0x88] sm:$0xff] %v552_v48  ;;  %v737_v49 = vpop.f32.mrb[4].mxu0  ;;  %v753_v50 = vpop.f32.mrb[4].mxu1 }
 0x102   : > { %v433_v51 = vadd.f32 %v737_v49, %v898_v24  ;;  %v497_v52 = vadd.f32 %v753_v50, %v898_v24  ;;  %v424_v53 = vpop.f32.mrb[5].mxu0  ;;  %v488_v54 = vpop.f32.mrb[5].mxu1 }
 0x103   : > { %v425_v55 = vadd.f32 %v898_v24, %v424_v53  ;;  %v489_v56 = vadd.f32 %v898_v24, %v488_v54  ;;  %v738_v57 = vpop.f32.mrb[6].mxu0  ;;  %v754_v58 = vpop.f32.mrb[6].mxu1 }
 0x104   : > { %v541_v59 = vmax.f32 %v433_v51, 0.0  ;;  %v557_v60 = vmax.f32 %v497_v52, 0.0  ;;  %v436_v61 = vadd.f32 %v738_v57, %v898_v24  ;;  %v500_v62 = vadd.f32 %v754_v58, %v898_v24  ;;  %v427_v63 = vpop.f32.mrb[7].mxu0  ;;  %v491_v0 = vpop.f32.mrb[7].mxu1 }
 0x105   : > { %v539_v1 = vmax.f32 %v425_v55, 0.0  ;;  %v555_v2 = vmax.f32 %v489_v56, 0.0  ;;  %v428_v3 = vadd.f32 %v898_v24, %v427_v63  ;;  %v492_v4 = vadd.f32 %v898_v24, %v491_v0 }
 0x106   : > { %573 = vst [vmem:[%s906_s14 + $0x30] sm:$0xff] %v541_v59  ;;  %589 = vst [vmem:[%s906_s14 + $0xb0] sm:$0xff] %v557_v60  ;;  %v542_v5 = vmax.f32 %v436_v61, 0.0  ;;  %v558_v6 = vmax.f32 %v500_v62, 0.0 }
 0x107   : > { %571 = vst [vmem:[%s906_s14 + $0x20] sm:$0xff] %v539_v1  ;;  %587 = vst [vmem:[%s906_s14 + $0xa0] sm:$0xff] %v555_v2  ;;  %v540_v7 = vmax.f32 %v428_v3, 0.0  ;;  %v556_v8 = vmax.f32 %v492_v4, 0.0 }
 0x108   : > { %574 = vst [vmem:[%s906_s14 + $0x38] sm:$0xff] %v542_v5  ;;  %590 = vst [vmem:[%s906_s14 + $0xb8] sm:$0xff] %v558_v6 }
 0x109   : > { %572 = vst [vmem:[%s906_s14 + $0x28] sm:$0xff] %v540_v7  ;;  %588 = vst [vmem:[%s906_s14 + $0xa8] sm:$0xff] %v556_v8  ;;  %v741_v9 = vpop.f32.mrb[8].mxu0  ;;  %v757_v10 = vpop.f32.mrb[8].mxu1 }
 0x10a   : > { %v449_v11 = vadd.f32 %v741_v9, %v898_v24  ;;  %v513_v12 = vadd.f32 %v757_v10, %v898_v24  ;;  %v440_v13 = vpop.f32.mrb[9].mxu0  ;;  %v504_v14 = vpop.f32.mrb[9].mxu1 }
 0x10b   : > { %v441_v15 = vadd.f32 %v898_v24, %v440_v13  ;;  %v505_v16 = vadd.f32 %v898_v24, %v504_v14  ;;  %v742_v17 = vpop.f32.mrb[10].mxu0  ;;  %v758_v18 = vpop.f32.mrb[10].mxu1 }
 0x10c   : > { %v545_v19 = vmax.f32 %v449_v11, 0.0  ;;  %v561_v20 = vmax.f32 %v513_v12, 0.0  ;;  %v452_v21 = vadd.f32 %v742_v17, %v898_v24  ;;  %v516_v22 = vadd.f32 %v758_v18, %v898_v24  ;;  %v443_v23 = vpop.f32.mrb[11].mxu0  ;;  %v507_v25 = vpop.f32.mrb[11].mxu1 }
 0x10d   : > { %v543_v26 = vmax.f32 %v441_v15, 0.0  ;;  %v559_v27 = vmax.f32 %v505_v16, 0.0  ;;  %v444_v28 = vadd.f32 %v898_v24, %v443_v23  ;;  %v508_v29 = vadd.f32 %v898_v24, %v507_v25 }
 0x10e   : > { %577 = vst [vmem:[%s906_s14 + $0x50] sm:$0xff] %v545_v19  ;;  %593 = vst [vmem:[%s906_s14 + $0xd0] sm:$0xff] %v561_v20  ;;  %v546_v30 = vmax.f32 %v452_v21, 0.0  ;;  %v562_v31 = vmax.f32 %v516_v22, 0.0 }
 0x10f   : > { %575 = vst [vmem:[%s906_s14 + $0x40] sm:$0xff] %v543_v26  ;;  %591 = vst [vmem:[%s906_s14 + $0xc0] sm:$0xff] %v559_v27  ;;  %v544_v32 = vmax.f32 %v444_v28, 0.0  ;;  %v560_v33 = vmax.f32 %v508_v29, 0.0 }
 0x110   : > { %578 = vst [vmem:[%s906_s14 + $0x58] sm:$0xff] %v546_v30  ;;  %594 = vst [vmem:[%s906_s14 + $0xd8] sm:$0xff] %v562_v31 }
 0x111   : > { %576 = vst [vmem:[%s906_s14 + $0x48] sm:$0xff] %v544_v32  ;;  %592 = vst [vmem:[%s906_s14 + $0xc8] sm:$0xff] %v560_v33  ;;  %v745_v34 = vpop.f32.mrb[12].mxu0  ;;  %v761_v35 = vpop.f32.mrb[12].mxu1 }
 0x112   : > { %v465_v36 = vadd.f32 %v745_v34, %v898_v24  ;;  %v529_v37 = vadd.f32 %v761_v35, %v898_v24  ;;  %v456_v38 = vpop.f32.mrb[13].mxu0  ;;  %v520_v39 = vpop.f32.mrb[13].mxu1 }
 0x113   : > { %v457_v40 = vadd.f32 %v898_v24, %v456_v38  ;;  %v521_v41 = vadd.f32 %v898_v24, %v520_v39  ;;  %v746_v42 = vpop.f32.mrb[14].mxu0  ;;  %v762_v43 = vpop.f32.mrb[14].mxu1 }
 0x114   : > { %v549_v44 = vmax.f32 %v465_v36, 0.0  ;;  %v565_v45 = vmax.f32 %v529_v37, 0.0  ;;  %v468_v46 = vadd.f32 %v746_v42, %v898_v24  ;;  %v532_v47 = vadd.f32 %v762_v43, %v898_v24  ;;  %v459_v48 = vpop.f32.mrb[15].mxu0  ;;  %v523_v49 = vpop.f32.mrb[15].mxu1 }
 0x115   : > { %v547_v50 = vmax.f32 %v457_v40, 0.0  ;;  %v563_v51 = vmax.f32 %v521_v41, 0.0  ;;  %v460_v52 = vadd.f32 %v898_v24, %v459_v48  ;;  %v524_v53 = vadd.f32 %v898_v24, %v523_v49 }
 0x116   : > { %581 = vst [vmem:[%s906_s14 + $0x70] sm:$0xff] %v549_v44  ;;  %597 = vst [vmem:[%s906_s14 + $0xf0] sm:$0xff] %v565_v45  ;;  %v550_v54 = vmax.f32 %v468_v46, 0.0  ;;  %v566_v55 = vmax.f32 %v532_v47, 0.0 }
 0x117   : > { %579 = vst [vmem:[%s906_s14 + $0x60] sm:$0xff] %v547_v50  ;;  %595 = vst [vmem:[%s906_s14 + $0xe0] sm:$0xff] %v563_v51  ;;  %v548_v56 = vmax.f32 %v460_v52, 0.0  ;;  %v564_v57 = vmax.f32 %v524_v53, 0.0 }
 0x118   : > { %582 = vst [vmem:[%s906_s14 + $0x78] sm:$0xff] %v550_v54  ;;  %598 = vst [vmem:[%s906_s14 + $0xf8] sm:$0xff] %v566_v55 }
 0x119   : > { %580 = vst [vmem:[%s906_s14 + $0x68] sm:$0xff] %v548_v56  ;;  %596 = vst [vmem:[%s906_s14 + $0xe8] sm:$0xff] %v564_v57 }
 0x11a PF: > { %s13_s12 = sadd.s32 1, %s817_s12  }
 0x11b   : > { %p10_p4 = scmp.ge.s32.totalorder %s13_s12, 4  }
 0x11d   :  { %12 = sbr.rel (!%p10_p4) target bundleno = 1 (0x1), region = 62 }

</bundles_post_ra>
